<compile_context>
chip_gen: v7x
topology: tpu7x:2x2x1
jax: 0.10.0
libtpu: 0.0.40
codegen_flags: <defaults>
</compile_context>

<pallas_src>
import functools

import jax
import jax.numpy as jnp
from jax import lax
from jax.experimental import pallas as pl
from jax.experimental.pallas import tpu as pltpu


# ---------------------------------------------------------------------------
# Helpers
# ---------------------------------------------------------------------------

def _round_up(a, m):
    return (a + m - 1) // m * m


def _vmem_capacity_bytes():
    """Physical VMEM per core; conservative (v7x-sized) fallback."""
    try:
        cap = int(pltpu.get_tpu_info().vmem_capacity_bytes)
        if cap > 0:
            return cap
    except Exception:
        pass
    return 64 * 1024 * 1024


# ---------------------------------------------------------------------------
# Kernels
# ---------------------------------------------------------------------------

def _bn_relu_phased_kernel(x_ref, gamma_ref, beta_ref, y_ref,
                           xcache_ref, acc1_ref, acc2_ref,
                           scale_ref, shift_ref, *, inv_n, eps):
    """Fused BN(train)+ReLU, single call, phased grid (2, nt).

    phase 0: DMA x tiles in (pipelined), cache them in VMEM, accumulate
             lane-wide sum / sum-of-squares (VPU-only), finalize scale/shift
             on the last tile (single XLU cross-lane reduce).
    phase 1: apply relu(x*scale + shift) from the VMEM cache and stream the
             output tiles back to HBM (pipelined).  Total HBM traffic = 2x.
    """
    phase = pl.program_id(0)
    t = pl.program_id(1)
    nt = pl.num_programs(1)

    @pl.when((phase == 0) & (t == 0))
    def _init():
        acc1_ref[...] = jnp.zeros_like(acc1_ref)
        acc2_ref[...] = jnp.zeros_like(acc2_ref)

    @pl.when(phase == 0)
    def _stats():
        x = x_ref[...]                                        # (B, C, tile)
        xcache_ref[t] = x
        acc1_ref[...] += jnp.sum(x, axis=0, keepdims=True)    # VPU adds
        acc2_ref[...] += jnp.sum(x * x, axis=0, keepdims=True)  # VPU mul+add

    @pl.when((phase == 0) & (t == nt - 1))
    def _finalize():
        s1 = jnp.sum(acc1_ref[...], axis=2, keepdims=True)    # one XLU reduce
        s2 = jnp.sum(acc2_ref[...], axis=2, keepdims=True)
        mean = s1 * inv_n
        var = jnp.maximum(s2 * inv_n - mean * mean, 0.0)      # clamp cancellation
        scale = gamma_ref[...] * lax.rsqrt(var + eps)
        scale_ref[...] = scale
        shift_ref[...] = beta_ref[...] - mean * scale

    @pl.when(phase == 1)
    def _apply():
        y_ref[...] = jnp.maximum(
            xcache_ref[t] * scale_ref[...] + shift_ref[...], 0.0)


def _bn_stats_kernel(x_ref, s1_ref, s2_ref, acc1_ref, acc2_ref):
    """Two-pass path, pass 1: per-split partial channel sums.

    grid = (nsplit, nb, nt); leading axis is 'parallel' so on multi-core
    parts (v7x) the two splits run on different TensorCores, each producing
    its own exact partial (sum, sumsq).  Hot loop is VPU-only; the single
    cross-lane reduce happens once per split at the end.
    """
    b = pl.program_id(1)
    t = pl.program_id(2)

    @pl.when((b == 0) & (t == 0))
    def _init():
        acc1_ref[...] = jnp.zeros_like(acc1_ref)
        acc2_ref[...] = jnp.zeros_like(acc2_ref)

    x = x_ref[...]                                            # (tb, C, tile)
    acc1_ref[...] += jnp.sum(x, axis=0, keepdims=True)
    acc2_ref[...] += jnp.sum(x * x, axis=0, keepdims=True)

    @pl.when((b == pl.num_programs(1) - 1) & (t == pl.num_programs(2) - 1))
    def _fin():
        s1_ref[...] = jnp.sum(acc1_ref[...], axis=2, keepdims=True)
        s2_ref[...] = jnp.sum(acc2_ref[...], axis=2, keepdims=True)


def _bn_apply_kernel(scale_ref, shift_ref, x_ref, y_ref):
    """Two-pass path, pass 2: y = relu(x*scale + shift), per-channel bcast."""
    y_ref[...] = jnp.maximum(
        x_ref[...] * scale_ref[...] + shift_ref[...], 0.0)


# ---------------------------------------------------------------------------
# Wrapper
# ---------------------------------------------------------------------------

def bn_relu(x, gamma, beta, *, eps=1e-5, mode=None, hw_tile=None):
    """Training-mode BatchNorm2d + ReLU on NCHW input."""
    B, C, H, W = x.shape
    HW = H * W
    inv_n = 1.0 / float(B * HW)

    xr = x.astype(jnp.float32).reshape(B, C, HW)              # lane-dense layout
    g = gamma.reshape(1, C, 1).astype(jnp.float32)
    bt = beta.reshape(1, C, 1).astype(jnp.float32)

    # Pad lanes to a multiple of 128.  Zero padding is exact for the stats
    # (inv_n uses the true count); padded lanes are sliced off afterwards.
    HWp = HW if HW % 128 == 0 else _round_up(HW, 128)
    if HWp != HW:
        xr = jnp.pad(xr, ((0, 0), (0, 0), (0, HWp - HW)))

    Cp = _round_up(C, 8)                                      # sublane-padded rows

    vmem_cap = _vmem_capacity_bytes()                         # 128 MiB v5e/v6e, 64 MiB v7x
    vmem_limit_cap = (vmem_cap * 3) // 4                      # scoped limit we request
    fused_budget = vmem_cap // 2                              # VMEM the fused path may use

    def pick_lanes(target_bytes, bytes_per_lane):
        lanes = max(128, (target_bytes // bytes_per_lane) // 128 * 128)
        lanes = min(lanes, HWp)
        while HWp % lanes != 0:
            lanes -= 128
        return lanes

    if hw_tile is not None:
        assert HWp % hw_tile == 0 and (hw_tile % 128 == 0 or hw_tile == HWp), \
            "hw_tile must divide padded H*W and be a multiple of 128"

    # --- fused (phased, x cached in VMEM) path sizing -----------------------
    f_tile = hw_tile if hw_tile is not None else pick_lanes(2 << 20, B * Cp * 4)
    f_nt = HWp // f_tile
    f_block = B * Cp * f_tile * 4
    f_need = (f_nt * f_block            # x cache
              + 4 * f_block             # double-buffered x-in + y-out blocks
              + 2 * Cp * f_tile * 4     # lane-wide accumulators
              + (1 << 20))              # params / scale / shift / slack
    fused_ok = f_need <= fused_budget

    if mode is None:
        mode = "fused" if fused_ok else "two_pass"

    if mode == "fused":
        nt = f_nt
        tile = f_tile
        # x index pinned during phase 1 (no second HBM read of x);
        # y index pinned during phase 0 (no writeback until apply starts).
        x_spec = pl.BlockSpec(
            (B, C, tile), lambda p, t: (0, 0, (1 - p) * t + p * (nt - 1)))
        y_spec = pl.BlockSpec((B, C, tile), lambda p, t: (0, 0, p * t))
        par_spec = pl.BlockSpec((1, C, 1), lambda p, t: (0, 0, 0))

        y = pl.pallas_call(
            functools.partial(_bn_relu_phased_kernel, inv_n=inv_n, eps=eps),
            out_shape=jax.ShapeDtypeStruct((B, C, HWp), jnp.float32),
            grid=(2, nt),
            in_specs=[x_spec, par_spec, par_spec],
            out_specs=y_spec,
            scratch_shapes=[
                pltpu.VMEM((nt, B, C, tile), jnp.float32),    # x cache
                pltpu.VMEM((1, C, tile), jnp.float32),        # sum accumulator
                pltpu.VMEM((1, C, tile), jnp.float32),        # sumsq accumulator
                pltpu.VMEM((1, C, 1), jnp.float32),           # scale
                pltpu.VMEM((1, C, 1), jnp.float32),           # shift
            ],
            compiler_params=pltpu.CompilerParams(
                dimension_semantics=("arbitrary", "arbitrary"),
                vmem_limit_bytes=int(min(vmem_limit_cap, f_need + (8 << 20)))),
        )(xr, g, bt)

    else:
        # --- two-pass tiled path (x too large for the fused VMEM budget) ----
        block_budget = min(8 << 20, max(2 << 20, vmem_limit_cap // 6))

        tb = B
        while tb > 1 and tb * Cp * 128 * 4 > block_budget:
            tb -= 1
            while B % tb != 0:
                tb -= 1
        # TODO(synk): channel tiling (needed only if Cp*128*4 alone exceeds the
        # block budget, i.e. >16K channels) is not implemented.

        tile = hw_tile if hw_tile is not None else pick_lanes(
            block_budget, tb * Cp * 4)
        nb = B // tb
        nt_total = HWp // tile
        nsplit = 2 if (nt_total >= 2 and nt_total % 2 == 0) else 1
        nth = nt_total // nsplit

        block = tb * Cp * tile * 4
        acc = 2 * Cp * tile * 4
        stats_limit = int(min(vmem_limit_cap, 3 * block + acc + (8 << 20)))
        apply_limit = int(min(vmem_limit_cap, 5 * block + (8 << 20)))

        x_stats_spec = pl.BlockSpec(
            (tb, C, tile), lambda s, b, t: (b, 0, s * nth + t))
        part_spec = pl.BlockSpec((1, C, 1), lambda s, b, t: (s, 0, 0))

        s1p, s2p = pl.pallas_call(
            _bn_stats_kernel,
            out_shape=(jax.ShapeDtypeStruct((nsplit, C, 1), jnp.float32),
                       jax.ShapeDtypeStruct((nsplit, C, 1), jnp.float32)),
            grid=(nsplit, nb, nth),
            in_specs=[x_stats_spec],
            out_specs=(part_spec, part_spec),
            scratch_shapes=[pltpu.VMEM((1, C, tile), jnp.float32),
                            pltpu.VMEM((1, C, tile), jnp.float32)],
            compiler_params=pltpu.CompilerParams(
                dimension_semantics=("parallel", "arbitrary", "arbitrary"),
                vmem_limit_bytes=stats_limit),
        )(xr)

        # Tiny exact finalize (C elements) in plain XLA.
        s1 = jnp.sum(s1p, axis=0, keepdims=True)              # (1, C, 1)
        s2 = jnp.sum(s2p, axis=0, keepdims=True)
        mean = s1 * inv_n
        var = jnp.maximum(s2 * inv_n - mean * mean, 0.0)
        scale = g * lax.rsqrt(var + eps)
        shift = bt - mean * scale

        x_spec = pl.BlockSpec((tb, C, tile), lambda b, t: (b, 0, t))
        par2_spec = pl.BlockSpec((1, C, 1), lambda b, t: (0, 0, 0))

        y = pl.pallas_call(
            _bn_apply_kernel,
            out_shape=jax.ShapeDtypeStruct((B, C, HWp), jnp.float32),
            grid=(nb, nt_total),
            in_specs=[par2_spec, par2_spec, x_spec],
            out_specs=x_spec,
            compiler_params=pltpu.CompilerParams(
                dimension_semantics=("parallel", "parallel"),
                vmem_limit_bytes=apply_limit),
        )(scale, shift, xr)

    if HWp != HW:
        y = y[:, :, :HW]
    return y.reshape(B, C, H, W)


# ---------------------------------------------------------------------------
# Test
# ---------------------------------------------------------------------------

if __name__ == "__main__":
    key = jax.random.PRNGKey(0)
    kx, kg, kb = jax.random.split(key, 3)
    B, C, H, W = 2, 4, 16, 16

    x = jax.random.normal(kx, (B, C, H, W), dtype=jnp.float32)
    gamma = (1.0 + 0.1 * jax.random.normal(kg, (C,))).astype(jnp.float32)
    beta = (0.1 * jax.random.normal(kb, (C,))).astype(jnp.float32)

    # Pure-JAX reference: PyTorch training-mode BatchNorm2d + ReLU.
    mu = jnp.mean(x, axis=(0, 2, 3), keepdims=True)
    var = jnp.mean((x - mu) ** 2, axis=(0, 2, 3), keepdims=True)
    ref = jnp.maximum(
        (x - mu) * lax.rsqrt(var + 1e-5) * gamma[None, :, None, None]
        + beta[None, :, None, None], 0.0)

    # 1) auto dispatch (fused phased path, single tile).
    y_auto = jax.jit(lambda xx: bn_relu(xx, gamma, beta))(x)
    # 2) fused phased path with a multi-tile grid (exercises cache + phases).
    y_fused = jax.jit(
        lambda xx: bn_relu(xx, gamma, beta, mode="fused", hw_tile=128))(x)
    # 3) two-pass tiled path (exercises split stats pass + parallel apply).
    y_two = jax.jit(
        lambda xx: bn_relu(xx, gamma, beta, mode="two_pass", hw_tile=128))(x)

    jax.block_until_ready((y_auto, y_fused, y_two))

    for name, y in (("auto", y_auto), ("fused", y_fused), ("two_pass", y_two)):
        assert y.shape == (B, C, H, W), name
        assert jnp.allclose(y, ref, atol=1e-4, rtol=1e-4), name

    print("KERNEL_OK")
</pallas_src>

<mosaic_0001>
module attributes {stable_mosaic.version = 11 : i64} {
  func.func @_bn_relu_phased_kernel(%arg0: i32, %arg1: i32, %arg2: memref<2x4x256xf32, #tpu.memory_space<vmem>>, %arg3: memref<1x4x1xf32, #tpu.memory_space<vmem>>, %arg4: memref<1x4x1xf32, #tpu.memory_space<vmem>>, %arg5: memref<2x4x256xf32, #tpu.memory_space<vmem>>, %arg6: memref<1x2x4x256xf32, #tpu.memory_space<vmem>>, %arg7: memref<1x4x256xf32, #tpu.memory_space<vmem>>, %arg8: memref<1x4x256xf32, #tpu.memory_space<vmem>>, %arg9: memref<1x4x1xf32, #tpu.memory_space<vmem>>, %arg10: memref<1x4x1xf32, #tpu.memory_space<vmem>>) attributes {dimension_semantics = [#tpu.dimension_semantics<arbitrary>, #tpu.dimension_semantics<arbitrary>], iteration_bounds = array<i64: 2, 1>, scalar_prefetch = 0 : i64, scratch_operands = 5 : i64, tpu.core_type = #tpu.core_type<tc>, window_params = [{transform_indices = @transform_0, window_bounds = array<i64: 2, 4, 256>}, {pipeline_mode = #tpu.pipeline_mode<synchronous>, transform_indices = @transform_1, window_bounds = array<i64: 1, 4, 1>}, {pipeline_mode = #tpu.pipeline_mode<synchronous>, transform_indices = @transform_2, window_bounds = array<i64: 1, 4, 1>}, {transform_indices = @transform_3, window_bounds = array<i64: 2, 4, 256>}]} {
    %c0_i32 = arith.constant 0 : i32
    %0 = arith.cmpi eq, %arg0, %c0_i32 : i32
    %c0_i32_0 = arith.constant 0 : i32
    %1 = arith.cmpi eq, %arg1, %c0_i32_0 : i32
    %2 = arith.andi %0, %1 : i1
    %3 = arith.extui %2 : i1 to i32
    %c0_i32_1 = arith.constant 0 : i32
    %4 = arith.cmpi ne, %3, %c0_i32_1 : i32
    scf.if %4 {
      %cst = arith.constant 0.000000e+00 : f32
      %16 = vector.broadcast %cst : f32 to vector<1x4x256xf32>
      %c0 = arith.constant 0 : index
      %c0_8 = arith.constant 0 : index
      %c0_9 = arith.constant 0 : index
      %17 = vector.load %arg7[%c0, %c0_8, %c0_9] : memref<1x4x256xf32, #tpu.memory_space<vmem>>, vector<1x4x256xf32>
      tpu.vector_store %arg7[%c0, %c0_8, %c0_9], %16 {strides = array<i32>} : memref<1x4x256xf32, #tpu.memory_space<vmem>>, vector<1x4x256xf32>,
      %cst_10 = arith.constant 0.000000e+00 : f32
      %18 = vector.broadcast %cst_10 : f32 to vector<1x4x256xf32>
      %c0_11 = arith.constant 0 : index
      %c0_12 = arith.constant 0 : index
      %c0_13 = arith.constant 0 : index
      %19 = vector.load %arg8[%c0_11, %c0_12, %c0_13] : memref<1x4x256xf32, #tpu.memory_space<vmem>>, vector<1x4x256xf32>
      tpu.vector_store %arg8[%c0_11, %c0_12, %c0_13], %18 {strides = array<i32>} : memref<1x4x256xf32, #tpu.memory_space<vmem>>, vector<1x4x256xf32>,
    } else {
    }
    %c0_i32_2 = arith.constant 0 : i32
    %5 = arith.cmpi eq, %arg0, %c0_i32_2 : i32
    %6 = arith.extui %5 : i1 to i32
    %c0_i32_3 = arith.constant 0 : i32
    %7 = arith.cmpi ne, %6, %c0_i32_3 : i32
    scf.if %7 {
      %c0 = arith.constant 0 : index
      %c0_8 = arith.constant 0 : index
      %c0_9 = arith.constant 0 : index
      %16 = vector.load %arg2[%c0, %c0_8, %c0_9] : memref<2x4x256xf32, #tpu.memory_space<vmem>>, vector<2x4x256xf32>
      %17 = arith.index_cast %arg1 : i32 to index
      %c0_10 = arith.constant 0 : index
      %c0_11 = arith.constant 0 : index
      %c0_12 = arith.constant 0 : index
      %18 = vector.load %arg6[%17, %c0_10, %c0_11, %c0_12] : memref<1x2x4x256xf32, #tpu.memory_space<vmem>>, vector<1x2x4x256xf32>
      %19 = vector.shape_cast %18 : vector<1x2x4x256xf32> to vector<2x4x256xf32>
      %20 = vector.shape_cast %16 : vector<2x4x256xf32> to vector<1x2x4x256xf32>
      tpu.vector_store %arg6[%17, %c0_10, %c0_11, %c0_12], %20 {strides = array<i32>} : memref<1x2x4x256xf32, #tpu.memory_space<vmem>>, vector<1x2x4x256xf32>,
      %c0_13 = arith.constant 0 : index
      %c0_14 = arith.constant 0 : index
      %c0_15 = arith.constant 0 : index
      %21 = vector.load %arg7[%c0_13, %c0_14, %c0_15] : memref<1x4x256xf32, #tpu.memory_space<vmem>>, vector<1x4x256xf32>
      %cst = arith.constant dense<0.000000e+00> : vector<4x256xf32>
      %22 = vector.multi_reduction <add>, %16, %cst [0] : vector<2x4x256xf32> to vector<4x256xf32>
      %23 = vector.shape_cast %22 : vector<4x256xf32> to vector<1x4x256xf32>
      %24 = arith.addf %21, %23 : vector<1x4x256xf32>
      %c0_16 = arith.constant 0 : index
      %c0_17 = arith.constant 0 : index
      %c0_18 = arith.constant 0 : index
      %25 = vector.load %arg7[%c0_16, %c0_17, %c0_18] : memref<1x4x256xf32, #tpu.memory_space<vmem>>, vector<1x4x256xf32>
      tpu.vector_store %arg7[%c0_16, %c0_17, %c0_18], %24 {strides = array<i32>} : memref<1x4x256xf32, #tpu.memory_space<vmem>>, vector<1x4x256xf32>,
      %c0_19 = arith.constant 0 : index
      %c0_20 = arith.constant 0 : index
      %c0_21 = arith.constant 0 : index
      %26 = vector.load %arg8[%c0_19, %c0_20, %c0_21] : memref<1x4x256xf32, #tpu.memory_space<vmem>>, vector<1x4x256xf32>
      %27 = arith.mulf %16, %16 : vector<2x4x256xf32>
      %cst_22 = arith.constant dense<0.000000e+00> : vector<4x256xf32>
      %28 = vector.multi_reduction <add>, %27, %cst_22 [0] : vector<2x4x256xf32> to vector<4x256xf32>
      %29 = vector.shape_cast %28 : vector<4x256xf32> to vector<1x4x256xf32>
      %30 = arith.addf %26, %29 : vector<1x4x256xf32>
      %c0_23 = arith.constant 0 : index
      %c0_24 = arith.constant 0 : index
      %c0_25 = arith.constant 0 : index
      %31 = vector.load %arg8[%c0_23, %c0_24, %c0_25] : memref<1x4x256xf32, #tpu.memory_space<vmem>>, vector<1x4x256xf32>
      tpu.vector_store %arg8[%c0_23, %c0_24, %c0_25], %30 {strides = array<i32>} : memref<1x4x256xf32, #tpu.memory_space<vmem>>, vector<1x4x256xf32>,
    } else {
    }
    %c0_i32_4 = arith.constant 0 : i32
    %8 = arith.cmpi eq, %arg0, %c0_i32_4 : i32
    %c0_i32_5 = arith.constant 0 : i32
    %9 = arith.cmpi eq, %arg1, %c0_i32_5 : i32
    %10 = arith.andi %8, %9 : i1
    %11 = arith.extui %10 : i1 to i32
    %c0_i32_6 = arith.constant 0 : i32
    %12 = arith.cmpi ne, %11, %c0_i32_6 : i32
    scf.if %12 {
      %c0 = arith.constant 0 : index
      %c0_8 = arith.constant 0 : index
      %c0_9 = arith.constant 0 : index
      %16 = vector.load %arg7[%c0, %c0_8, %c0_9] : memref<1x4x256xf32, #tpu.memory_space<vmem>>, vector<1x4x256xf32>
      %cst = arith.constant dense<0.000000e+00> : vector<1x4xf32>
      %17 = vector.multi_reduction <add>, %16, %cst [2] : vector<1x4x256xf32> to vector<1x4xf32>
      %18 = vector.shape_cast %17 : vector<1x4xf32> to vector<1x4x1xf32>
      %c0_10 = arith.constant 0 : index
      %c0_11 = arith.constant 0 : index
      %c0_12 = arith.constant 0 : index
      %19 = vector.load %arg8[%c0_10, %c0_11, %c0_12] : memref<1x4x256xf32, #tpu.memory_space<vmem>>, vector<1x4x256xf32>
      %cst_13 = arith.constant dense<0.000000e+00> : vector<1x4xf32>
      %20 = vector.multi_reduction <add>, %19, %cst_13 [2] : vector<1x4x256xf32> to vector<1x4xf32>
      %21 = vector.shape_cast %20 : vector<1x4xf32> to vector<1x4x1xf32>
      %cst_14 = arith.constant 0.001953125 : f32
      %22 = vector.broadcast %cst_14 : f32 to vector<1x4x1xf32>
      %23 = arith.mulf %18, %22 : vector<1x4x1xf32>
      %cst_15 = arith.constant 0.001953125 : f32
      %24 = vector.broadcast %cst_15 : f32 to vector<1x4x1xf32>
      %25 = arith.mulf %21, %24 : vector<1x4x1xf32>
      %26 = arith.mulf %23, %23 : vector<1x4x1xf32>
      %27 = arith.subf %25, %26 : vector<1x4x1xf32>
      %cst_16 = arith.constant 0.000000e+00 : f32
      %28 = vector.broadcast %cst_16 : f32 to vector<1x4x1xf32>
      %29 = arith.maximumf %27, %28 : vector<1x4x1xf32>
      %c0_17 = arith.constant 0 : index
      %c0_18 = arith.constant 0 : index
      %c0_19 = arith.constant 0 : index
      %30 = vector.load %arg3[%c0_17, %c0_18, %c0_19] : memref<1x4x1xf32, #tpu.memory_space<vmem>>, vector<1x4x1xf32>
      %cst_20 = arith.constant 9.99999974E-6 : f32
      %31 = vector.broadcast %cst_20 : f32 to vector<1x4x1xf32>
      %32 = arith.addf %29, %31 : vector<1x4x1xf32>
      %33 = math.rsqrt %32 : vector<1x4x1xf32>
      %34 = arith.mulf %30, %33 : vector<1x4x1xf32>
      %c0_21 = arith.constant 0 : index
      %c0_22 = arith.constant 0 : index
      %c0_23 = arith.constant 0 : index
      %35 = vector.load %arg9[%c0_21, %c0_22, %c0_23] : memref<1x4x1xf32, #tpu.memory_space<vmem>>, vector<1x4x1xf32>
      tpu.vector_store %arg9[%c0_21, %c0_22, %c0_23], %34 {strides = array<i32>} : memref<1x4x1xf32, #tpu.memory_space<vmem>>, vector<1x4x1xf32>,
      %c0_24 = arith.constant 0 : index
      %c0_25 = arith.constant 0 : index
      %c0_26 = arith.constant 0 : index
      %36 = vector.load %arg4[%c0_24, %c0_25, %c0_26] : memref<1x4x1xf32, #tpu.memory_space<vmem>>, vector<1x4x1xf32>
      %37 = arith.mulf %23, %34 : vector<1x4x1xf32>
      %38 = arith.subf %36, %37 : vector<1x4x1xf32>
      %c0_27 = arith.constant 0 : index
      %c0_28 = arith.constant 0 : index
      %c0_29 = arith.constant 0 : index
      %39 = vector.load %arg10[%c0_27, %c0_28, %c0_29] : memref<1x4x1xf32, #tpu.memory_space<vmem>>, vector<1x4x1xf32>
      tpu.vector_store %arg10[%c0_27, %c0_28, %c0_29], %38 {strides = array<i32>} : memref<1x4x1xf32, #tpu.memory_space<vmem>>, vector<1x4x1xf32>,
    } else {
    }
    %c1_i32 = arith.constant 1 : i32
    %13 = arith.cmpi eq, %arg0, %c1_i32 : i32
    %14 = arith.extui %13 : i1 to i32
    %c0_i32_7 = arith.constant 0 : i32
    %15 = arith.cmpi ne, %14, %c0_i32_7 : i32
    scf.if %15 {
      %16 = arith.index_cast %arg1 : i32 to index
      %c0 = arith.constant 0 : index
      %c0_8 = arith.constant 0 : index
      %c0_9 = arith.constant 0 : index
      %17 = vector.load %arg6[%16, %c0, %c0_8, %c0_9] : memref<1x2x4x256xf32, #tpu.memory_space<vmem>>, vector<1x2x4x256xf32>
      %18 = vector.shape_cast %17 : vector<1x2x4x256xf32> to vector<2x4x256xf32>
      %c0_10 = arith.constant 0 : index
      %c0_11 = arith.constant 0 : index
      %c0_12 = arith.constant 0 : index
      %19 = vector.load %arg9[%c0_10, %c0_11, %c0_12] : memref<1x4x1xf32, #tpu.memory_space<vmem>>, vector<1x4x1xf32>
      %20 = vector.broadcast %19 : vector<1x4x1xf32> to vector<2x4x256xf32>
      %21 = arith.mulf %18, %20 : vector<2x4x256xf32>
      %c0_13 = arith.constant 0 : index
      %c0_14 = arith.constant 0 : index
      %c0_15 = arith.constant 0 : index
      %22 = vector.load %arg10[%c0_13, %c0_14, %c0_15] : memref<1x4x1xf32, #tpu.memory_space<vmem>>, vector<1x4x1xf32>
      %23 = vector.broadcast %22 : vector<1x4x1xf32> to vector<2x4x256xf32>
      %24 = arith.addf %21, %23 : vector<2x4x256xf32>
      %cst = arith.constant 0.000000e+00 : f32
      %25 = vector.broadcast %cst : f32 to vector<2x4x256xf32>
      %26 = arith.maximumf %24, %25 : vector<2x4x256xf32>
      %c0_16 = arith.constant 0 : index
      %c0_17 = arith.constant 0 : index
      %c0_18 = arith.constant 0 : index
      %27 = vector.load %arg5[%c0_16, %c0_17, %c0_18] : memref<2x4x256xf32, #tpu.memory_space<vmem>>, vector<2x4x256xf32>
      tpu.vector_store %arg5[%c0_16, %c0_17, %c0_18], %26 {strides = array<i32>} : memref<2x4x256xf32, #tpu.memory_space<vmem>>, vector<2x4x256xf32>,
    } else {
    }
    return
  }
  func.func @transform_0(%arg0: i32, %arg1: i32) -> (i32, i32, i32) {
    %c1_i32 = arith.constant 1 : i32
    %0 = arith.subi %c1_i32, %arg0 : i32
    %1 = arith.muli %0, %arg1 : i32
    %c0_i32 = arith.constant 0 : i32
    %2 = arith.muli %arg0, %c0_i32 : i32
    %3 = arith.addi %1, %2 : i32
    %c0_i32_0 = arith.constant 0 : i32
    %c0_i32_1 = arith.constant 0 : i32
    %c0_i32_2 = arith.constant 0 : i32
    return %c0_i32_0, %c0_i32_1, %3 : i32, i32, i32
  }
  func.func @transform_1(%arg0: i32, %arg1: i32) -> (i32, i32, i32) {
    %c0_i32 = arith.constant 0 : i32
    %c0_i32_0 = arith.constant 0 : i32
    %c0_i32_1 = arith.constant 0 : i32
    %c0_i32_2 = arith.constant 0 : i32
    return %c0_i32, %c0_i32_0, %c0_i32_1 : i32, i32, i32
  }
  func.func @transform_2(%arg0: i32, %arg1: i32) -> (i32, i32, i32) {
    %c0_i32 = arith.constant 0 : i32
    %c0_i32_0 = arith.constant 0 : i32
    %c0_i32_1 = arith.constant 0 : i32
    %c0_i32_2 = arith.constant 0 : i32
    return %c0_i32, %c0_i32_0, %c0_i32_1 : i32, i32, i32
  }
  func.func @transform_3(%arg0: i32, %arg1: i32) -> (i32, i32, i32) {
    %0 = arith.muli %arg0, %arg1 : i32
    %c0_i32 = arith.constant 0 : i32
    %c0_i32_0 = arith.constant 0 : i32
    %c0_i32_1 = arith.constant 0 : i32
    return %c0_i32, %c0_i32_0, %0 : i32, i32, i32
  }
}

</mosaic_0001>

<bundles_post_ra>
// kernel: _lambda_.1
= control target key start
LH: loop header
LB: loop body
LE: loop exit
PB: predicated region body
PF: predicated region fallthrough
CT: control target
= control target key end

     0   :  { %s510_s12 = smov 0   ;;  %s512_s13 = smov 0   ;;  %s572_s0 = inlined_call_operand.vmem [shape: f32[2,4,256], index: 0, kind: input, shape index: {}]   ;;  %s573_s1 = inlined_call_operand.vmem [shape: f32[1,4,1], index: 1, kind: input, shape index: {}]   ;;  %s574_s2 = inlined_call_operand.vmem [shape: f32[1,4,1], index: 2, kind: input, shape index: {}]   ;;  %s575_s3 = inlined_call_operand.vmem [shape: f32[2,4,256], index: 3, kind: output, shape index: {}]  }
   0x1   :  { %s514_s14 = smov 0  }
   0x2 LB: > { %s25_s15 = sadd.s32 1, %s481_s13  ;;  %p420_p0 = scmp.ge.s32.totalorder %s485_s14, 1  ;;  %s485_s14 = sphi %s514_s14, %s13_s14   ;;  %s481_s13 = sphi %s512_s13, %s577_s13   ;;  %s477_s12 = sphi %s510_s12, %s576_s12  }
   0x3   : > { %p27_p1 = scmp.ge.s32.totalorder %s25_s15, 2  ;;  %p160_p2 = scmp.lt.s32.totalorder %s485_s14, 3 }
   0x5   : > { %s579_s15 = smov (%p27_p1, %s25_s15), 0  ;;  %p161_p3 = pnand %p420_p0, %p160_p2 }
   0x6   : > { %p205_p4 = scmp.eq.s32.totalorder (!%p161_p3), %s477_s12, 0 }
   0x7   : > { %164 = sbr.rel (%p161_p3) target bundleno = 359 (0x167), region = 32 }
   0xe   : > { %210 = sbr.rel (!%p205_p4) target bundleno = 21 (0x15), region = 36  ;;  %v487_v0 = vmov (%p205_p4), 0.0  }
   0xf   : > { %211 = vst [vmem:[#allocation3] sm:$0xff] (%p205_p4), %v487_v0  ;;  %212 = vst [vmem:[#allocation4] sm:$0xff] (%p205_p4), %v487_v0 }
  0x15 PF: > { %p422_p5 = scmp.ne.s32.totalorder %s477_s12, 0 }
  0x16   : > { %v216_v1 = vld [vmem:[%s572_s0] sm:$0xff] (!%p422_p5)  ;;  %v217_v2 = vld [vmem:[%s572_s0 + $0x8] sm:$0xff] (!%p422_p5)  ;;  %vm230_vm0 = vcmask (!%p422_p5), 1043456   ;;  %v223_v17 = vld [vmem:[#allocation3] sm:$0xff] (!%p422_p5) }
  0x17   : > { %215 = sbr.rel (%p422_p5) target bundleno = 36 (0x24), region = 40  ;;  %221 = vst [vmem:[#allocation2] sm:$0xff] (!%p422_p5), %v216_v1  ;;  %v226_v3 = vcombine.high (!%p422_p5), %v216_v1, %v216_v1  ;;  %v244_v4 = vmul.f32 (!%p422_p5), %v216_v1, %v216_v1  ;;  %222 = vst [vmem:[#allocation2 + $0x8] sm:$0xff] (!%p422_p5), %v217_v2  ;;  %v227_v5 = vcombine.high (!%p422_p5), %v217_v2, %v217_v2  ;;  %v231_v7 = vsel (!%p422_p5), %vm230_vm0, %v216_v1, 0.0  ;;  %v243_v24 = vld [vmem:[#allocation4] sm:$0xff] (!%p422_p5) }
  0x18   : > { %v245_v6 = vmul.f32 (!%p422_p5), %v217_v2, %v217_v2  ;;  %v232_v8 = vsel (!%p422_p5), %vm230_vm0, %v217_v2, 0.0 }
  0x19   : > { %v233_v9 = vadd.f32 (!%p422_p5), %v232_v8, %v231_v7  ;;  %v234_v10 = vsel (!%p422_p5), %vm230_vm0, %v226_v3, 0.0  ;;  %v235_v11 = vsel (!%p422_p5), %vm230_vm0, %v227_v5, 0.0  ;;  %v248_v12 = vcombine.high (!%p422_p5), %v244_v4, %v244_v4 }
  0x1a   : > { %v236_v13 = vadd.f32 (!%p422_p5), %v235_v11, %v234_v10  ;;  %v249_v14 = vcombine.high (!%p422_p5), %v245_v6, %v245_v6  ;;  %v252_v15 = vsel (!%p422_p5), %vm230_vm0, %v244_v4, 0.0  ;;  %v253_v16 = vsel (!%p422_p5), %vm230_vm0, %v245_v6, 0.0 }
  0x1b   : > { %v254_v18 = vadd.f32 (!%p422_p5), %v253_v16, %v252_v15  ;;  %v255_v19 = vsel (!%p422_p5), %vm230_vm0, %v248_v12, 0.0 }
  0x1c   : > { %v239_v20 = vcombine.low (!%p422_p5), %v233_v9, %v236_v13  ;;  %v256_v21 = vsel (!%p422_p5), %vm230_vm0, %v249_v14, 0.0 }
  0x1d   : > { %v257_v22 = vadd.f32 (!%p422_p5), %v256_v21, %v255_v19 }
  0x1e   : > { %v241_v23 = vadd.f32 %v239_v20, %v223_v17 }
  0x1f   : > { %v260_v25 = vcombine.low %v254_v18, %v257_v22 }
  0x20   : > { %242 = vst [vmem:[#allocation3] sm:$0xff] %v241_v23 }
  0x21   : > { %v262_v26 = vadd.f32 %v260_v25, %v243_v24 }
  0x23   : > { %263 = vst [vmem:[#allocation4] sm:$0xff] %v262_v26 }
  0x24 PF: > { %265 = sbr.rel (!%p205_p4) target bundleno = 217 (0xd9), region = 44  ;;  %vm270_vm1 = vcmask (%p205_p4), 1043456   ;;  %v290_v45 = vld [vmem:[%s573_s1] sm:$0xf] (%p205_p4)  ;;  %vm294_vm2 = vcmask (%p205_p4), 3072  }
  0x25   : > { %v296_v48 = vld [vmem:[%s574_s2] sm:$0xf] (%p205_p4) }
  0x27   : > { %v266_v27 = vld [vmem:[#allocation3] sm:$0xff] (%p205_p4) }
  0x28   : > { %v268_v29 = vcombine.high (%p205_p4), %v266_v27, %v266_v27  ;;  %v271_v30 = vsel (%p205_p4), %vm270_vm1, %v266_v27, 0.0 }
  0x2a   : > { %v276_v28 = vld [vmem:[#allocation4] sm:$0xff] (%p205_p4)  ;;  %v272_v32 = vsel (%p205_p4), %vm270_vm1, %v268_v29, 0.0 }
  0x2b   : > { %v278_v31 = vcombine.high %v276_v28, %v276_v28  ;;  %v280_v33 = vsel %vm270_vm1, %v276_v28, 0.0  ;;  %v273_v35 = vadd.f32 %v272_v32, %v271_v30 }
  0x2d   : > { %v281_v34 = vsel %vm270_vm1, %v278_v31, 0.0  ;;  %274 = vadd.xlane.f32.xlu0 %v273_v35 }
  0x2e   : > { %v282_v36 = vadd.f32 %v281_v34, %v280_v33 }
  0x31   : > { %283 = vadd.xlane.f32.xlu0 %v282_v36 }
  0xba   : > { %v275_v37 = vpop.xlane.xlu0 %274 }
  0xbb   : > { %v285_v38 = vmul.f32 0.001953125, %v275_v37 }
  0xbd   : > { %v287_v40 = vmul.f32 %v285_v38, %v285_v38 }
  0xbe   : > { %v284_v39 = vpop.xlane.xlu0 %283 }
  0xbf   : > { %v286_v41 = vmul.f32 0.001953125, %v284_v39 }
  0xc1   : > { %v288_v42 = vsub.f32 %v286_v41, %v287_v40 }
  0xc3   : > { %v289_v43 = vmax.f32 %v288_v42, 0.0 }
  0xc5   : > { %v291_v44 = vadd.f32 1e-05, %v289_v43 }
  0xc7   : > { %460 = vrsqrt.f32 %v291_v44 }
  0xd1   : > { %v461_v46 = vpop.eup %460 }
  0xd2   : > { %v293_v47 = vmul.f32 %v461_v46, %v290_v45 }
  0xd4   : > { %295 = vst.msk [vmem:[#allocation5] sm:$0xf] %vm294_vm2, %v293_v47  ;;  %v297_v49 = vmul.f32 %v293_v47, %v285_v38 }
  0xd6   : > { %v298_v50 = vsub.f32 %v296_v48, %v297_v49 }
  0xd8   : > { %299 = vst.msk [vmem:[#allocation6] sm:$0xf] %vm294_vm2, %v298_v50 }
  0xd9 PF: > { %p423_p6 = scmp.ne.s32.totalorder %s477_s12, 1 }
  0xda   : > { %v488_v52 = vmov (!%p423_p6), 0   ;;  %v489_v54 = vmov (!%p423_p6), 839922192   ;;  %v317_v56 = vlaneseq (!%p423_p6)  ;;  %v307_v62 = vld [vmem:[#allocation2] sm:$0xff] (!%p423_p6)  ;;  %v308_v63 = vld [vmem:[#allocation2 + $0x8] sm:$0xff] (!%p423_p6) }
  0xdb   : > { %303 = sbr.rel (%p423_p6) target bundleno = 359 (0x167), region = 48  ;;  %v309_v51 = vld [vmem:[#allocation5] sm:$0xf] (!%p423_p6)  ;;  %462 = vset.pattern.permute.xlu0 (!%p423_p6), %v488_v52  ;;  %v315_v55 = vunpack.c.l.s4 (!%p423_p6), %v489_v54 }
  0xdc   : > { %312 = vperm.xlu0 (!%p423_p6), %462, %v309_v51   ;;  %v318_v58 = vshrl.u32 (!%p423_p6), %v317_v56, 7 }
  0xdd   : > { %v316_v57 = vunpack.c.0.s8 (!%p423_p6), %v315_v55 }
  0xdf   : > { %v324_v53 = vld [vmem:[#allocation6] sm:$0xf] (!%p423_p6)  ;;  %v319_v59 = vsub.s32 (!%p423_p6), %v316_v57, %v318_v58 }
  0xe0   : > { %327 = vperm.xlu0 (!%p423_p6), %462, %v324_v53  }
 0x15b   : > { %v313_v60 = vpop.permute.xlu0 %312 }
 0x15c   : > { %v320_v61 = vrot.slane %v313_v60, %v319_v59 }
 0x15e   : > { %v322_v1 = vmul.f32 %v320_v61, %v307_v62  ;;  %v323_v2 = vmul.f32 %v320_v61, %v308_v63 }
 0x15f   : > { %v328_v0 = vpop.permute.xlu0 %327 }
 0x160   : > { %v335_v3 = vrot.slane %v328_v0, %v319_v59 }
 0x162   : > { %v337_v4 = vadd.f32 %v335_v3, %v322_v1  ;;  %v338_v5 = vadd.f32 %v335_v3, %v323_v2 }
 0x164   : > { %v339_v6 = vmax.f32 %v337_v4, 0.0  ;;  %v340_v7 = vmax.f32 %v338_v5, 0.0 }
 0x166   : > { %341 = vst [vmem:[%s575_s3] sm:$0xff] %v339_v6  ;;  %342 = vst [vmem:[%s575_s3 + $0x8] sm:$0xff] %v340_v7 }
 0x167 PF: > { %s13_s14 = sadd.s32 1, %s485_s14   ;;  %s576_s12 = smov %s481_s13 }
 0x168   : > { %p10_p7 = scmp.ge.s32.totalorder %s13_s14, 4   ;;  %s577_s13 = smov %s579_s15 }
 0x16a   :  { %12 = sbr.rel (!%p10_p7) target bundleno = 2 (0x2), region = 80 }

</bundles_post_ra>
